<compile_context>
chip_gen: v5e
topology: v5e:2x2
jax: 0.10.0
libtpu: 0.0.40
codegen_flags: <defaults>
</compile_context>

<pallas_src>
import functools

import jax
import jax.numpy as jnp
from jax import lax
from jax.experimental import pallas as pl
from jax.experimental.pallas import tpu as pltpu


def _round_up(x, m):
    return (x + m - 1) // m * m


def _pick_row_tile(H):
    """Output rows per grid step.

    Prefer big lane-dense tiles (>=128 rows) at realistic sizes; at toy sizes
    prefer >=2 H-tiles so the grid has at least 2x num_TensorCores steps
    (v7x megacore + pipeline priming).
    """
    for th in (512, 256, 128):
        if H % th == 0:
            return th
    for th in (64, 32, 16, 8):
        if H % th == 0 and H // th >= 2:
            return th
    return H


def upsampler_kernel(x_ref, w_ref, b_ref, o_ref, *, K, TH):
    """One grid step = (batch n, row-tile th).

    x_ref : (1, 1, TH+K-1, Lpad)  zero-padded input rows incl. halo; lanes are
                                  (w_padded, Cin) zero-padded to 128*k (bf16)
    w_ref : (K, Lpad, NCOL)       banded fused weight (depthwise*pointwise*BN),
                                  columns pre-ordered as (ry, w, rx, c) (bf16)
    b_ref : (1, NCOL)             fused bias (pointwise bias + BN shift), f32
    o_ref : (1, TH, NCOL)         lane-dense output slab, bf16
    """
    # K MXU matmuls over the 128-aligned contraction axis, f32 accumulation.
    # TODO(synk): at >=256-row tiles, accumulate into a pltpu.VMEM scratch (or
    # stack the K shifted row windows along the contraction axis into a single
    # K*Lpad-deep matmul) instead of chaining vreg accumulators.
    acc = jnp.zeros(o_ref.shape[1:], jnp.float32)          # (TH, NCOL)
    for ky in range(K):
        acc = acc + jnp.dot(x_ref[0, 0, ky:ky + TH, :], w_ref[ky],
                            preferred_element_type=jnp.float32)
    # Fused bias + ReLU epilogue in f32 (v5e has no bf16 VALU), cast on store.
    o_ref[0] = jnp.maximum(acc + b_ref[...], 0.0).astype(o_ref.dtype)


def upsampler_forward_nhwc(x_nhwc, w_dw, w_pw, b_pw, bn_gamma, bn_beta,
                           bn_mean, bn_var, *, kernel_size, scale, eps=1e-5,
                           out_dtype=jnp.bfloat16):
    """NHWC Upsampler forward: (N, H, W, C) -> (N, H*scale, W*scale, C).

    PixelShuffle is encoded in the weight column ordering; the kernel output
    reshapes to the final NHWC tensor with zero data movement.
    """
    N, H, W, C = x_nhwc.shape
    K = kernel_size
    p = K // 2
    r = scale
    Cout = w_pw.shape[-1]
    assert Cout == C * r * r
    Hp, Wp = H + 2 * p, W + 2 * p
    ncol = r * W * r * C

    # ---- one-time weight folding (XLA glue) ---------------------------------
    # Fold BatchNorm (inference running stats) into the pointwise conv.
    # TODO(synk): train-mode BatchNorm (batch statistics over N,H,W) is not
    # computed in-kernel; inference-mode running stats are folded instead.
    s = (bn_gamma / jnp.sqrt(bn_var + eps)).astype(jnp.float32)      # (Cout,)
    w_pw_f = w_pw.astype(jnp.float32) * s[None, :]                   # (C, Cout)
    b_f = (b_pw - bn_mean) * s + bn_beta                             # (Cout,)

    # Banded fused weight: depthwise * pointwise * BN, with output columns
    # ordered (ry, w, rx, c) so PixelShuffle becomes a free reshape:
    #   out[h, ((ry*W+w)*r+rx)*C + c]
    #     = sum_{ky,wp,ci} xpad[h+ky, wp*C+ci] * band[ky, wp*C+ci, col]
    #   band[ky, wp*C+ci, col] = w_dw[ky, wp-w, ci] * w_pw_f[ci, c*r*r+ry*r+rx]
    # (zero outside the 0 <= wp-w < K band).
    kx = jnp.arange(Wp)[:, None] - jnp.arange(W)[None, :]            # (Wp, W)
    valid = (kx >= 0) & (kx < K)
    dw_g = w_dw.astype(jnp.float32)[:, jnp.clip(kx, 0, K - 1), :]    # (K,Wp,W,C)
    dw_g = jnp.where(valid[None, :, :, None], dw_g, 0.0)
    w_pw_4 = w_pw_f.reshape(C, C, r, r)                              # (ci,c,ry,rx)
    band = jnp.einsum("kpwi,icyx->kpiywxc", dw_g, w_pw_4)            # (K,Wp,C,r,W,r,C)
    band = band.reshape(K, Wp * C, ncol)
    # TODO(synk): at realistic widths also tile W — the full band is
    # O(W^2 * C^2 * r^2) and mostly zeros; a (K, (Wt+K-1)*C, Wt*r*r*C) band is
    # shift-invariant and shared by every W-tile (keeps weights at a few
    # hundred KiB and removes zero-multiplies; critical for v7x's 64 MiB VMEM).

    # Fused bias, columns in the same (ry, w, rx, c) order.
    b4 = jnp.transpose(b_f.reshape(C, r, r), (1, 2, 0))              # (ry,rx,c)
    b_row = jnp.broadcast_to(b4[:, None, :, :], (r, W, r, C))
    b_row = b_row.reshape(1, ncol).astype(jnp.float32)

    # Pad the contraction (lane) axis to a multiple of 128 -> unmasked MXU loads.
    Lpad = _round_up(Wp * C, 128)
    band = jnp.pad(band, ((0, 0), (0, Lpad - Wp * C), (0, 0))).astype(jnp.bfloat16)

    # Zero-pad the input spatially (SAME), merge (W, C) onto the lane axis,
    # pad lanes to Lpad.
    xpad = jnp.pad(x_nhwc.astype(jnp.float32), ((0, 0), (p, p), (p, p), (0, 0)))
    x2 = xpad.reshape(N, Hp, Wp * C)
    x2 = jnp.pad(x2, ((0, 0), (0, 0), (0, Lpad - Wp * C))).astype(jnp.bfloat16)

    # H-tiling with a materialized (K-1)-row halo per tile, so each grid step
    # DMAs only its own rows (never the whole padded image).
    # TODO(synk): at large H, express the halo with an overlapping
    # pl.Element-indexed input BlockSpec instead of materializing it here.
    TH = _pick_row_tile(H)
    n_th = H // TH
    halo = K - 1
    row_idx = jnp.arange(n_th)[:, None] * TH + jnp.arange(TH + halo)[None, :]
    x_tiles = x2[:, row_idx, :]                          # (N, n_th, TH+halo, Lpad)

    kern = functools.partial(upsampler_kernel, K=K, TH=TH)
    y = pl.pallas_call(
        kern,
        out_shape=jax.ShapeDtypeStruct((N, H, ncol), out_dtype),
        grid_spec=pltpu.PrefetchScalarGridSpec(
            num_scalar_prefetch=0,
            grid=(N, n_th),
            in_specs=[
                pl.BlockSpec((1, 1, TH + halo, Lpad), lambda n, t: (n, t, 0, 0)),
                # Weight / bias index_maps are constant, so the pipeline DMAs
                # them once and re-uses them across all grid steps.  When the
                # (W-tiled) weight reaches MiB scale, single-buffer it
                # (pl.Buffered(1)) to halve its VMEM footprint on v7x.
                pl.BlockSpec((K, Lpad, ncol), lambda n, t: (0, 0, 0)),
                pl.BlockSpec((1, ncol), lambda n, t: (0, 0)),
            ],
            out_specs=pl.BlockSpec((1, TH, ncol), lambda n, t: (n, t, 0)),
        ),
        compiler_params=pltpu.CompilerParams(
            dimension_semantics=("parallel", "parallel"),
            # Explicit VMEM budget: safe on every generation (v5e default is
            # only 16 MiB scoped; v7x physical is 64 MiB).
            vmem_limit_bytes=32 * 1024 * 1024,
        ),
    )(x_tiles, band, b_row)

    # PixelShuffle already lives in the column order: pure (free) reshape.
    return y.reshape(N, H * r, W * r, C)


def upsampler_forward(x_nchw, w_dw, w_pw, b_pw, bn_gamma, bn_beta,
                      bn_mean, bn_var, *, kernel_size, scale, eps=1e-5,
                      out_dtype=jnp.bfloat16):
    """NCHW entry point matching the PyTorch module: (N,C,H,W) -> (N,C,H*r,W*r).

    The NCHW<->NHWC transposes exist only to mirror the PyTorch API; call
    upsampler_forward_nhwc directly in an NHWC-layout model to drop them.
    """
    x_nhwc = jnp.transpose(x_nchw, (0, 2, 3, 1))
    y = upsampler_forward_nhwc(x_nhwc, w_dw, w_pw, b_pw, bn_gamma, bn_beta,
                               bn_mean, bn_var, kernel_size=kernel_size,
                               scale=scale, eps=eps, out_dtype=out_dtype)
    return jnp.transpose(y, (0, 3, 1, 2))


def reference_forward(x_nchw, w_dw, w_pw, b_pw, bn_gamma, bn_beta,
                      bn_mean, bn_var, *, kernel_size, scale, eps=1e-5):
    """Pure-JAX f32 reference (lax.conv) with identical semantics."""
    N, C, H, W = x_nchw.shape
    K = kernel_size
    p = K // 2
    r = scale

    x = jnp.transpose(x_nchw, (0, 2, 3, 1)).astype(jnp.float32)      # NHWC
    w = w_dw.reshape(K, K, 1, C).astype(jnp.float32)                 # HWIO, I=1
    dw = lax.conv_general_dilated(
        x, w, window_strides=(1, 1), padding=[(p, p), (p, p)],
        dimension_numbers=("NHWC", "HWIO", "NHWC"),
        feature_group_count=C)
    pw = jnp.einsum("nhwc,cd->nhwd", dw, w_pw.astype(jnp.float32)) + b_pw
    y = (pw - bn_mean) / jnp.sqrt(bn_var + eps) * bn_gamma + bn_beta
    y = y.reshape(N, H, W, C, r, r)
    y = jnp.transpose(y, (0, 3, 1, 4, 2, 5)).reshape(N, C, H * r, W * r)
    return jnp.maximum(y, 0.0)


if __name__ == "__main__":
    # Small shapes: Upsampler(channel=4, kernel_size=3, scale=2)
    N, C, H, W = 2, 4, 16, 16
    K, r = 3, 2
    Cout = C * r * r

    key = jax.random.PRNGKey(0)
    k = jax.random.split(key, 8)
    x = jax.random.normal(k[0], (N, C, H, W), jnp.float32)

    # Deterministic parameter init (synthetic; shapes follow the module).
    w_dw = 0.1 * jax.random.normal(k[1], (K, K, C), jnp.float32)        # depthwise
    w_pw = 0.1 * jax.random.normal(k[2], (C, Cout), jnp.float32)        # pointwise
    b_pw = 0.05 * jax.random.normal(k[3], (Cout,), jnp.float32)
    bn_gamma = 1.0 + 0.1 * jax.random.normal(k[4], (Cout,), jnp.float32)
    bn_beta = 0.05 * jax.random.normal(k[5], (Cout,), jnp.float32)
    bn_mean = 0.1 * jax.random.normal(k[6], (Cout,), jnp.float32)
    bn_var = 0.5 + jax.random.uniform(k[7], (Cout,), jnp.float32)

    out = upsampler_forward(x, w_dw, w_pw, b_pw, bn_gamma, bn_beta,
                            bn_mean, bn_var, kernel_size=K, scale=r)
    out = jax.block_until_ready(out)

    ref = reference_forward(x, w_dw, w_pw, b_pw, bn_gamma, bn_beta,
                            bn_mean, bn_var, kernel_size=K, scale=r)
    ref = jax.block_until_ready(ref)

    assert out.shape == (N, C, H * r, W * r), out.shape
    out_f32 = out.astype(jnp.float32)
    # bf16 MXU inputs + bf16 output with f32 accumulation -> bf16-level tol.
    max_err = float(jnp.max(jnp.abs(out_f32 - ref)))
    assert jnp.allclose(out_f32, ref, atol=2e-2, rtol=2e-2), max_err
    print("KERNEL_OK")
</pallas_src>

<mosaic_0001>
module attributes {stable_mosaic.version = 11 : i64} {
  func.func @upsampler_kernel(%arg0: i32, %arg1: i32, %arg2: memref<1x1x10x128xbf16, #tpu.memory_space<vmem>>, %arg3: memref<3x128x256xbf16, #tpu.memory_space<vmem>>, %arg4: memref<1x256xf32, #tpu.memory_space<vmem>>, %arg5: memref<1x8x256xbf16, #tpu.memory_space<vmem>>) attributes {dimension_semantics = [#tpu.dimension_semantics<parallel>, #tpu.dimension_semantics<parallel>], iteration_bounds = array<i64: 2, 2>, scalar_prefetch = 0 : i64, scratch_operands = 0 : i64, tpu.core_type = #tpu.core_type<tc>, window_params = [{transform_indices = @transform_0, window_bounds = array<i64: 1, 1, 10, 128>}, {pipeline_mode = #tpu.pipeline_mode<synchronous>, transform_indices = @transform_1, window_bounds = array<i64: 3, 128, 256>}, {pipeline_mode = #tpu.pipeline_mode<synchronous>, transform_indices = @transform_2, window_bounds = array<i64: 1, 256>}, {transform_indices = @transform_3, window_bounds = array<i64: 1, 8, 256>}]} {
    %cst = arith.constant 0.000000e+00 : f32
    %0 = vector.broadcast %cst : f32 to vector<8x256xf32>
    %c0 = arith.constant 0 : index
    %c0_0 = arith.constant 0 : index
    %c0_1 = arith.constant 0 : index
    %c0_2 = arith.constant 0 : index
    %1 = vector.load %arg2[%c0, %c0_0, %c0_1, %c0_2] : memref<1x1x10x128xbf16, #tpu.memory_space<vmem>>, vector<1x1x8x128xbf16>
    %2 = vector.shape_cast %1 : vector<1x1x8x128xbf16> to vector<8x128xbf16>
    %c0_3 = arith.constant 0 : index
    %c0_4 = arith.constant 0 : index
    %c0_5 = arith.constant 0 : index
    %3 = vector.load %arg3[%c0_3, %c0_4, %c0_5] : memref<3x128x256xbf16, #tpu.memory_space<vmem>>, vector<1x128x256xbf16>
    %4 = vector.shape_cast %3 : vector<1x128x256xbf16> to vector<128x256xbf16>
    %cst_6 = arith.constant dense<0.000000e+00> : vector<8x256xf32>
    %5 = tpu.matmul %2, %4, %cst_6 {dimension_numbers = #tpu.dot_dimension_numbers<[1], [0], [0], [1], [0, 0, 1, 1], [], []>} : vector<8x128xbf16>, vector<128x256xbf16>, vector<8x256xf32> -> vector<8x256xf32>
    %6 = arith.addf %0, %5 : vector<8x256xf32>
    %c0_7 = arith.constant 0 : index
    %c0_8 = arith.constant 0 : index
    %c1 = arith.constant 1 : index
    %c0_9 = arith.constant 0 : index
    %7 = vector.load %arg2[%c0_7, %c0_8, %c1, %c0_9] : memref<1x1x10x128xbf16, #tpu.memory_space<vmem>>, vector<1x1x8x128xbf16>
    %8 = vector.shape_cast %7 : vector<1x1x8x128xbf16> to vector<8x128xbf16>
    %c1_10 = arith.constant 1 : index
    %c0_11 = arith.constant 0 : index
    %c0_12 = arith.constant 0 : index
    %9 = vector.load %arg3[%c1_10, %c0_11, %c0_12] : memref<3x128x256xbf16, #tpu.memory_space<vmem>>, vector<1x128x256xbf16>
    %10 = vector.shape_cast %9 : vector<1x128x256xbf16> to vector<128x256xbf16>
    %cst_13 = arith.constant dense<0.000000e+00> : vector<8x256xf32>
    %11 = tpu.matmul %8, %10, %cst_13 {dimension_numbers = #tpu.dot_dimension_numbers<[1], [0], [0], [1], [0, 0, 1, 1], [], []>} : vector<8x128xbf16>, vector<128x256xbf16>, vector<8x256xf32> -> vector<8x256xf32>
    %12 = arith.addf %6, %11 : vector<8x256xf32>
    %c0_14 = arith.constant 0 : index
    %c0_15 = arith.constant 0 : index
    %c2 = arith.constant 2 : index
    %c0_16 = arith.constant 0 : index
    %13 = vector.load %arg2[%c0_14, %c0_15, %c2, %c0_16] : memref<1x1x10x128xbf16, #tpu.memory_space<vmem>>, vector<1x1x8x128xbf16>
    %14 = vector.shape_cast %13 : vector<1x1x8x128xbf16> to vector<8x128xbf16>
    %c2_17 = arith.constant 2 : index
    %c0_18 = arith.constant 0 : index
    %c0_19 = arith.constant 0 : index
    %15 = vector.load %arg3[%c2_17, %c0_18, %c0_19] : memref<3x128x256xbf16, #tpu.memory_space<vmem>>, vector<1x128x256xbf16>
    %16 = vector.shape_cast %15 : vector<1x128x256xbf16> to vector<128x256xbf16>
    %cst_20 = arith.constant dense<0.000000e+00> : vector<8x256xf32>
    %17 = tpu.matmul %14, %16, %cst_20 {dimension_numbers = #tpu.dot_dimension_numbers<[1], [0], [0], [1], [0, 0, 1, 1], [], []>} : vector<8x128xbf16>, vector<128x256xbf16>, vector<8x256xf32> -> vector<8x256xf32>
    %18 = arith.addf %12, %17 : vector<8x256xf32>
    %c0_21 = arith.constant 0 : index
    %c0_22 = arith.constant 0 : index
    %19 = vector.load %arg4[%c0_21, %c0_22] : memref<1x256xf32, #tpu.memory_space<vmem>>, vector<1x256xf32>
    %20 = vector.broadcast %19 : vector<1x256xf32> to vector<8x256xf32>
    %21 = arith.addf %18, %20 : vector<8x256xf32>
    %cst_23 = arith.constant 0.000000e+00 : f32
    %22 = vector.broadcast %cst_23 : f32 to vector<8x256xf32>
    %23 = arith.maximumf %21, %22 : vector<8x256xf32>
    %24 = arith.truncf %23 : vector<8x256xf32> to vector<8x256xbf16>
    %c0_24 = arith.constant 0 : index
    %c0_25 = arith.constant 0 : index
    %c0_26 = arith.constant 0 : index
    %25 = vector.load %arg5[%c0_24, %c0_25, %c0_26] : memref<1x8x256xbf16, #tpu.memory_space<vmem>>, vector<1x8x256xbf16>
    %26 = vector.shape_cast %25 : vector<1x8x256xbf16> to vector<8x256xbf16>
    %27 = vector.shape_cast %24 : vector<8x256xbf16> to vector<1x8x256xbf16>
    tpu.vector_store %arg5[%c0_24, %c0_25, %c0_26], %27 {strides = array<i32>} : memref<1x8x256xbf16, #tpu.memory_space<vmem>>, vector<1x8x256xbf16>,
    return
  }
  func.func @transform_0(%arg0: i32, %arg1: i32) -> (i32, i32, i32, i32) {
    %c0_i32 = arith.constant 0 : i32
    %c0_i32_0 = arith.constant 0 : i32
    %c0_i32_1 = arith.constant 0 : i32
    return %arg0, %arg1, %c0_i32, %c0_i32_0 : i32, i32, i32, i32
  }
  func.func @transform_1(%arg0: i32, %arg1: i32) -> (i32, i32, i32) {
    %c0_i32 = arith.constant 0 : i32
    %c0_i32_0 = arith.constant 0 : i32
    %c0_i32_1 = arith.constant 0 : i32
    %c0_i32_2 = arith.constant 0 : i32
    return %c0_i32, %c0_i32_0, %c0_i32_1 : i32, i32, i32
  }
  func.func @transform_2(%arg0: i32, %arg1: i32) -> (i32, i32) {
    %c0_i32 = arith.constant 0 : i32
    %c0_i32_0 = arith.constant 0 : i32
    %c0_i32_1 = arith.constant 0 : i32
    return %c0_i32, %c0_i32_0 : i32, i32
  }
  func.func @transform_3(%arg0: i32, %arg1: i32) -> (i32, i32, i32) {
    %c0_i32 = arith.constant 0 : i32
    %c0_i32_0 = arith.constant 0 : i32
    return %arg0, %arg1, %c0_i32 : i32, i32, i32
  }
}

</mosaic_0001>

<bundles_post_ra>
// kernel: tpu_custom_call.1
= control target key start
LH: loop header
LB: loop body
LE: loop exit
PB: predicated region body
PF: predicated region fallthrough
CT: control target
= control target key end

     0   :  { %8 = vsyncpa [#allocation3], 0  ;;  %s1392_s0 = inlined_call_operand.vmem [shape: bf16[2,2,10,128], index: 0, kind: input, shape index: {}]   ;;  %s1393_s1 = inlined_call_operand.hbm [shape: bf16[3,128,256], index: 1, kind: input, shape index: {}]   ;;  %s1394_s2 = inlined_call_operand.vmem [shape: f32[1,256], index: 2, kind: input, shape index: {}]   ;;  %s1395_s3 = inlined_call_operand.hbm [shape: bf16[2,16,256], index: 3, kind: output, shape index: {}]  }
   0x1   :  { %9 = vsyncpa [#allocation4], 0 }
   0x2   :  { %11 = vsyncpa [#allocation4 + $0x1], 0  ;;  %s1224_s12 = smov 0   ;;  %s1226_s13 = smov 0  }
   0x3   :  { %s1228_s14 = smov 0   ;;  %s1230_s15 = smov 0  }
   0x4   :  { %s1232_s16 = smov 0   ;;  %s1234_s17 = smov 0  }
   0x5   :  { %s1236_s18 = smov 0   ;;  %s1238_s19 = smov 0  }
   0x6 LB: > { %s730_s20 = sadd.s32 4294967295, %s1199_s19   ;;  %s731_s21 = sadd.s32 4294967294, %s1199_s19   ;;  %s1199_s19 = sphi %s1238_s19, %s17_s19   ;;  %s1195_s18 = sphi %s1236_s18, %s1406_s18   ;;  %s1191_s17 = sphi %s1234_s17, %s1405_s17   ;;  %s1187_s16 = sphi %s1232_s16, %s1404_s16   ;;  %s1183_s15 = sphi %s1230_s15, %s1403_s15   ;;  %s1179_s14 = sphi %s1228_s14, %s1402_s14   ;;  %s1175_s13 = sphi %s1226_s13, %s1401_s13   ;;  %s1171_s12 = sphi %s1224_s12, %s1400_s12  }
   0x7   : > { %s26_s22 = sadd.s32 1, %s1191_s17  ;;  %s29_s23 = sadd.s32 1, %s1195_s18 }
   0x8   : > { %p27_p0 = scmp.ge.s32.totalorder %s26_s22, 2  ;;  %s108_s24 = sadd.s32 1, %s1179_s14 }
   0x9   : > { %p118_p1 = scmp.ne.s32.totalorder %s1179_s14, %s1175_s13  ;;  %p119_p2 = scmp.eq.s32.totalorder %s730_s20, 3 }
   0xa   : > { %s1408_s22 = smov (%p27_p0, %s26_s22), 0  ;;  %s1410_s23 = smov (!%p27_p0, %s29_s23), %s1195_s18 }
   0xb   : > { %s104_s25 = ssub.s32 %s1191_s17, %s1408_s22  ;;  %p1276_p3 = por %p119_p2, %p118_p1 }
   0xc   : > { %p31_p4 = scmp.ge.s32.totalorder %s1410_s23, 2  ;;  %p124_p5 = scmp.ne.s32.totalorder %s1175_s13, %s1171_s12 }
   0xd   : > { %p125_p6 = scmp.eq.s32.totalorder %s731_s21, 3  ;;  %p732_p7 = scmp.ge.s32.totalorder %s1199_s19, 1 }
   0xe   : > { %s1412_s23 = smov (%p31_p4, %s1410_s23), 0  ;;  %p132_p9 = scmp.lt.s32.totalorder %s1199_s19, 5 }
   0xf   : > { %p1285_p8 = por %p125_p6, %p124_p5  ;;  %s103_s28 = ssub.s32 %s1195_s18, %s1412_s23 }
  0x10   : > { %s105_s29 = sor.u32 %s104_s25, %s103_s28  ;;  %p1292_p10 = pnand %p732_p7, %p132_p9 }
  0x11   : > { %p106_p11 = scmp.eq.s32.totalorder %s105_s29, 0  ;;  %p1296_p12 = scmp.eq.s32.totalorder %s730_s20, 0 }
  0x12   : > { %p993_p13 = pneg %p1292_p10  ;;  %s143_s7 = sshll.u32 %s1393_s1, 4  ;;  %s144_s7 = int_to_ptr.hbm [resolvable:$true] %s143_s7 }
  0x13   : > { %s1306_s8 = scalar_select %p106_p11, %s1179_s14, %s108_s24  }
  0x14   : > { %s1201_s9 = smov [#allocation2]   ;;  %p994_p0 = pnand %p1296_p12, %p993_p13 }
  0x15   : > { %s145_s10 = sshll.u32 %s1201_s9, 4  ;;  %s1202_s11 = smov 128   ;;  %s146_s10 = int_to_ptr.vmem [resolvable:$true] %s145_s10 }
  0x16   : > { %s1203_s20 = smov 8   ;;  %176 = sbr.rel (%p1292_p10) target bundleno = 232 (0xe8), region = 32 }
  0x17   : > { %996 = dma.hbm_to_vmem [thread:$0]  (!%p994_p0), %s144_s7, 6144, %s146_s10, [#allocation3], %s1202_s11, %s1202_s11, %s1203_s20  }
  0x1b   : > { %1162 = dma.done.wait (%p1296_p12), [#allocation3], 6144  }
  0x1c   : > { %1164 = vsyncadd (%p1296_p12), [#allocation3], 4294961152  ;;  %v799_v0 = vld [vmem:[#allocation2 + $0xf0] sm:$0xf]  ;;  %v970_v1 = vld [vmem:[#allocation2 + $0xf4] sm:$0xf0] }
  0x1d   : > { %v969_v2 = vld [vmem:[#allocation2 + $0xf4] sm:$0xf]  ;;  %v800_v3 = vor.u32 %v970_v1, %v799_v0  ;;  %v801_v4 = vld [vmem:[#allocation2 + $0xf8] sm:$0xf0]  ;;  %v791_v5 = vld [vmem:[#allocation2 + $0xe0] sm:$0xf] }
  0x1e   : > { %v968_v6 = vld [vmem:[#allocation2 + $0xe4] sm:$0xf0]  ;;  %v804_v7 = vor.u32 %v969_v2, %v801_v4  ;;  %v967_v8 = vld [vmem:[#allocation2 + $0xe4] sm:$0xf]  ;;  %v793_v9 = vld [vmem:[#allocation2 + $0xe8] sm:$0xf0] }
  0x1f   : > { %v863_v10 = vld [vmem:[#allocation2 + $0x70] sm:$0xf]  ;;  %342 = vmatpush.bf16.msra.mxu0 %v800_v3  ;;  %v792_v11 = vor.u32 %v968_v6, %v791_v5  ;;  %v954_v12 = vld [vmem:[#allocation2 + $0x74] sm:$0xf0]  ;;  %v953_v13 = vld [vmem:[#allocation2 + $0x74] sm:$0xf]  ;;  %v796_v15 = vor.u32 %v967_v8, %v793_v9 }
  0x20   : > { %v865_v14 = vld [vmem:[#allocation2 + $0x78] sm:$0xf0]  ;;  %355 = vmatpush.bf16.msra.mxu1 %v804_v7  ;;  %v864_v16 = vor.u32 %v954_v12, %v863_v10  ;;  %v783_v18 = vld [vmem:[#allocation2 + $0xd0] sm:$0xf]  ;;  %v966_v19 = vld [vmem:[#allocation2 + $0xd4] sm:$0xf0] }
  0x21   : > { %v868_v17 = vor.u32 %v953_v13, %v865_v14  ;;  %v965_v20 = vld [vmem:[#allocation2 + $0xd4] sm:$0xf]  ;;  %v785_v21 = vld [vmem:[#allocation2 + $0xd8] sm:$0xf0]  ;;  %v855_v22 = vld [vmem:[#allocation2 + $0x60] sm:$0xf]  ;;  %v784_v27 = vor.u32 %v966_v19, %v783_v18 }
  0x22   : > { %v952_v23 = vld [vmem:[#allocation2 + $0x64] sm:$0xf0]  ;;  %448 = vmatpush.bf16.msra.mxu2 %v864_v16  ;;  %v951_v25 = vld [vmem:[#allocation2 + $0x64] sm:$0xf]  ;;  %v857_v26 = vld [vmem:[#allocation2 + $0x68] sm:$0xf0]  ;;  %v788_v31 = vor.u32 %v965_v20, %v785_v21 }
  0x23   : > { %461 = vmatpush.bf16.msra.mxu3 %v868_v17  ;;  %v856_v24 = vor.u32 %v952_v23, %v855_v22  ;;  %343 = vmatpush.bf16.msra.mxu0 %v792_v11  ;;  %v860_v28 = vor.u32 %v951_v25, %v857_v26  ;;  %v775_v29 = vld [vmem:[#allocation2 + $0xc0] sm:$0xf]  ;;  %v964_v30 = vld [vmem:[#allocation2 + $0xc4] sm:$0xf0]  ;;  %p205_p1 = scmp.lt.s32.totalorder %s1187_s16, 1  ;;  %p207_p2 = scmp.lt.s32.totalorder %s1183_s15, 1 }
  0x24   : > { %356 = vmatpush.bf16.msra.mxu1 %v796_v15  ;;  %v847_v32 = vld [vmem:[#allocation2 + $0x50] sm:$0xf]  ;;  %v950_v33 = vld [vmem:[#allocation2 + $0x54] sm:$0xf0]  ;;  %v949_v34 = vld [vmem:[#allocation2 + $0x54] sm:$0xf]  ;;  %v776_v41 = vor.u32 %v964_v30, %v775_v29 }
  0x25   : > { %v963_v35 = vld [vmem:[#allocation2 + $0xc4] sm:$0xf]  ;;  %v777_v36 = vld [vmem:[#allocation2 + $0xc8] sm:$0xf0]  ;;  %v849_v37 = vld [vmem:[#allocation2 + $0x58] sm:$0xf0]  ;;  %v848_v38 = vor.u32 %v950_v33, %v847_v32 }
  0x26   : > { %449 = vmatpush.bf16.msra.mxu2 %v856_v24  ;;  %v852_v39 = vor.u32 %v949_v34, %v849_v37  ;;  %v839_v40 = vld [vmem:[#allocation2 + $0x40] sm:$0xf]  ;;  %v948_v42 = vld [vmem:[#allocation2 + $0x44] sm:$0xf0]  ;;  %v947_v43 = vld [vmem:[#allocation2 + $0x44] sm:$0xf]  ;;  %v780_v45 = vor.u32 %v963_v35, %v777_v36 }
  0x27   : > { %462 = vmatpush.bf16.msra.mxu3 %v860_v28  ;;  %344 = vmatpush.bf16.msra.mxu0 %v784_v27  ;;  %v841_v44 = vld [vmem:[#allocation2 + $0x48] sm:$0xf0]  ;;  %v767_v46 = vld [vmem:[#allocation2 + $0xb0] sm:$0xf]  ;;  %v962_v47 = vld [vmem:[#allocation2 + $0xb4] sm:$0xf0]  ;;  %v840_v50 = vor.u32 %v948_v42, %v839_v40 }
  0x28   : > { %357 = vmatpush.bf16.msra.mxu1 %v788_v31  ;;  %v961_v48 = vld [vmem:[#allocation2 + $0xb4] sm:$0xf]  ;;  %v769_v49 = vld [vmem:[#allocation2 + $0xb8] sm:$0xf0]  ;;  %s1321_s21 = scalar_select %p205_p1, %s1187_s16, 1  ;;  %v844_v51 = vor.u32 %v947_v43, %v841_v44  ;;  %v768_v53 = vor.u32 %v962_v47, %v767_v46 }
  0x29   : > { %v831_v52 = vld [vmem:[#allocation2 + $0x30] sm:$0xf]  ;;  %s1326_s24 = scalar_select %p207_p2, %s1183_s15, 1  ;;  %v946_v54 = vld [vmem:[#allocation2 + $0x34] sm:$0xf0]  ;;  %v772_v57 = vor.u32 %v961_v48, %v769_v49 }
  0x2a   : > { %450 = vmatpush.bf16.msra.mxu2 %v848_v38  ;;  %v945_v55 = vld [vmem:[#allocation2 + $0x34] sm:$0xf]  ;;  %v833_v56 = vld [vmem:[#allocation2 + $0x38] sm:$0xf0]  ;;  %v759_v58 = vld [vmem:[#allocation2 + $0xa0] sm:$0xf]  ;;  %v832_v62 = vor.u32 %v946_v54, %v831_v52 }
  0x2b   : > { %463 = vmatpush.bf16.msra.mxu3 %v852_v39  ;;  %345 = vmatpush.bf16.msra.mxu0 %v776_v41  ;;  %v960_v59 = vld [vmem:[#allocation2 + $0xa4] sm:$0xf0]  ;;  %v959_v60 = vld [vmem:[#allocation2 + $0xa4] sm:$0xf]  ;;  %v761_v61 = vld [vmem:[#allocation2 + $0xa8] sm:$0xf0]  ;;  %v836_v63 = vor.u32 %v945_v55, %v833_v56 }
  0x2c   : > { %358 = vmatpush.bf16.msra.mxu1 %v780_v45  ;;  %v823_v0 = vld [vmem:[#allocation2 + $0x20] sm:$0xf]  ;;  %s738_s25 = sshll.u32 %s1326_s24, 1  ;;  %s739_s28 = sshll.u32 %s1321_s21, 2  ;;  %v760_v1 = vor.u32 %v960_v59, %v759_v58  ;;  %v944_v2 = vld [vmem:[#allocation2 + $0x24] sm:$0xf0]  ;;  %v764_v5 = vor.u32 %v959_v60, %v761_v61 }
  0x2d   : > { %v943_v3 = vld [vmem:[#allocation2 + $0x24] sm:$0xf]  ;;  %v825_v4 = vld [vmem:[#allocation2 + $0x28] sm:$0xf0]  ;;  %v751_v6 = vld [vmem:[#allocation2 + $0x90] sm:$0xf]  ;;  %s211_s29 = sadd.s32 %s739_s28, %s738_s25  ;;  %v824_v10 = vor.u32 %v944_v2, %v823_v0 }
  0x2e   : > { %451 = vmatpush.bf16.msra.mxu2 %v840_v50  ;;  %v958_v7 = vld [vmem:[#allocation2 + $0x94] sm:$0xf0]  ;;  %v957_v8 = vld [vmem:[#allocation2 + $0x94] sm:$0xf]  ;;  %v753_v9 = vld [vmem:[#allocation2 + $0x98] sm:$0xf0]  ;;  %v828_v11 = vor.u32 %v943_v3, %v825_v4 }
  0x2f   : > { %464 = vmatpush.bf16.msra.mxu3 %v844_v51  ;;  %346 = vmatpush.bf16.msra.mxu0 %v768_v53  ;;  %v743_v12 = vld [vmem:[#allocation2 + $0x80] sm:$0xf]  ;;  %v956_v13 = vld [vmem:[#allocation2 + $0x84] sm:$0xf0]  ;;  %v815_v14 = vld [vmem:[#allocation2 + $0x10] sm:$0xf]  ;;  %v752_v15 = vor.u32 %v958_v7, %v751_v6  ;;  %v756_v20 = vor.u32 %v957_v8, %v753_v9 }
  0x30   : > { %359 = vmatpush.bf16.msra.mxu1 %v772_v57  ;;  %v955_v16 = vld [vmem:[#allocation2 + $0x84] sm:$0xf]  ;;  %v942_v17 = vld [vmem:[#allocation2 + $0x14] sm:$0xf0]  ;;  %v941_v18 = vld [vmem:[#allocation2 + $0x14] sm:$0xf]  ;;  %v744_v31 = vor.u32 %v956_v13, %v743_v12 }
  0x31   : > { %v817_v19 = vld [vmem:[#allocation2 + $0x18] sm:$0xf0]  ;;  %v745_v21 = vld [vmem:[#allocation2 + $0x88] sm:$0xf0]  ;;  %v927_v22 = vld [vmem:[#allocation2 + $0x170] sm:$0xf]  ;;  %v816_v26 = vor.u32 %v942_v17, %v815_v14 }
  0x32   : > { %452 = vmatpush.bf16.msra.mxu2 %v832_v62  ;;  %s740_s30 = sshll.u32 %s211_s29, 2  ;;  %v986_v23 = vld [vmem:[#allocation2 + $0x174] sm:$0xf0]  ;;  %v985_v24 = vld [vmem:[#allocation2 + $0x174] sm:$0xf]  ;;  %v820_v27 = vor.u32 %v941_v18, %v817_v19  ;;  %v748_v37 = vor.u32 %v955_v16, %v745_v21  ;;  %s934_s7 = sshll.u32 %s1183_s15, 1 }
  0x33   : > { %465 = vmatpush.bf16.msra.mxu3 %v836_v63  ;;  %347 = vmatpush.bf16.msra.mxu0 %v760_v1  ;;  %v929_v25 = vld [vmem:[#allocation2 + $0x178] sm:$0xf0]  ;;  %s1333_s6 = scalar_lea.vmem %s1392_s0, %s740_s30  ;;  %v807_v28 = vld [vmem:[#allocation2] sm:$0xf]  ;;  %v940_v32 = vld [vmem:[#allocation2 + $0x4] sm:$0xf0]  ;;  %v928_v38 = vor.u32 %v986_v23, %v927_v22 }
  0x34   : > { %360 = vmatpush.bf16.msra.mxu1 %v764_v5  ;;  %v214_v29 = vld [vmem:[%s1333_s6] sm:$0xf]  ;;  %v1337_v30 = vld [vmem:[%s1333_s6 + $0x4] sm:$0x1]  ;;  %v809_v34 = vld [vmem:[#allocation2 + $0x8] sm:$0xf0]  ;;  %v932_v39 = vor.u32 %v985_v24, %v929_v25  ;;  %v808_v45 = vor.u32 %v940_v32, %v807_v28 }
  0x35   : > { %v939_v33 = vld [vmem:[#allocation2 + $0x4] sm:$0xf]  ;;  %v251_v35 = vunpack.c.l.b16 %v214_v29  ;;  %v252_v36 = vunpack.c.l.b16 %v1337_v30  ;;  %v919_v40 = vld [vmem:[#allocation2 + $0x160] sm:$0xf]  ;;  %v984_v41 = vld [vmem:[#allocation2 + $0x164] sm:$0xf0] }
  0x36   : > { %453 = vmatpush.bf16.msra.mxu2 %v824_v10  ;;  %v983_v43 = vld [vmem:[#allocation2 + $0x164] sm:$0xf]  ;;  %v921_v44 = vld [vmem:[#allocation2 + $0x168] sm:$0xf0]  ;;  %v812_v46 = vor.u32 %v939_v33, %v809_v34  ;;  %v920_v49 = vor.u32 %v984_v41, %v919_v40  ;;  %v911_v52 = vld [vmem:[#allocation2 + $0x150] sm:$0xf] }
  0x37   : > { %466 = vmatpush.bf16.msra.mxu3 %v828_v11  ;;  %348 = vmatpush.bf16.msra.mxu0 %v752_v15  ;;  %v253_v42 = vpack.c.b16 %v252_v36, %v251_v35  ;;  %v924_v50 = vor.u32 %v983_v43, %v921_v44  ;;  %v982_v53 = vld [vmem:[#allocation2 + $0x154] sm:$0xf0]  ;;  %v981_v54 = vld [vmem:[#allocation2 + $0x154] sm:$0xf]  ;;  %v913_v55 = vld [vmem:[#allocation2 + $0x158] sm:$0xf0] }
  0x38   : > { %361 = vmatpush.bf16.msra.mxu1 %v756_v20  ;;  %v912_v57 = vor.u32 %v982_v53, %v911_v52  ;;  %v916_v58 = vor.u32 %v981_v54, %v913_v55  ;;  %v903_v59 = vld [vmem:[#allocation2 + $0x140] sm:$0xf]  ;;  %v980_v60 = vld [vmem:[#allocation2 + $0x144] sm:$0xf0]  ;;  %v979_v61 = vld [vmem:[#allocation2 + $0x144] sm:$0xf] }
  0x39   : > { %v255_v47 = vshrl.u32 %v253_v42, 16  ;;  %v257_v48 = vshll.u32 %v253_v42, 16  ;;  %v905_v62 = vld [vmem:[#allocation2 + $0x148] sm:$0xf0]  ;;  %v904_v63 = vor.u32 %v980_v60, %v903_v59  ;;  %v895_v1 = vld [vmem:[#allocation2 + $0x130] sm:$0xf] }
  0x3a   : > { %454 = vmatpush.bf16.msra.mxu2 %v816_v26  ;;  %v908_v0 = vor.u32 %v979_v61, %v905_v62  ;;  %v978_v2 = vld [vmem:[#allocation2 + $0x134] sm:$0xf0]  ;;  %v977_v3 = vld [vmem:[#allocation2 + $0x134] sm:$0xf]  ;;  %v897_v4 = vld [vmem:[#allocation2 + $0x138] sm:$0xf0] }
  0x3b   : > { %467 = vmatpush.bf16.msra.mxu3 %v820_v27  ;;  %349 = vmatpush.bf16.msra.mxu0 %v744_v31  ;;  %v259_v51 = vrot.slane %v257_v48, 1  ;;  %v896_v5 = vor.u32 %v978_v2, %v895_v1  ;;  %v900_v6 = vor.u32 %v977_v3, %v897_v4  ;;  %v887_v7 = vld [vmem:[#allocation2 + $0x120] sm:$0xf]  ;;  %v976_v8 = vld [vmem:[#allocation2 + $0x124] sm:$0xf0]  ;;  %s935_s9 = sshll.u32 %s1187_s16, 2 }
  0x3c   : > { %362 = vmatpush.bf16.msra.mxu1 %v748_v37  ;;  %v975_v9 = vld [vmem:[#allocation2 + $0x124] sm:$0xf]  ;;  %v889_v10 = vld [vmem:[#allocation2 + $0x128] sm:$0xf0]  ;;  %v888_v11 = vor.u32 %v976_v8, %v887_v7  ;;  %v474_v12 = vld [vmem:[%s1333_s6] sm:$0xe]  ;;  %s629_s21 = sadd.s32 %s935_s9, %s934_s7 }
  0x3d   : > { %v260_v56 = vor.u32 %v259_v51, %v255_v47  ;;  %v892_v13 = vor.u32 %v975_v9, %v889_v10  ;;  %v879_v14 = vld [vmem:[#allocation2 + $0x110] sm:$0xf]  ;;  %v974_v15 = vld [vmem:[#allocation2 + $0x114] sm:$0xf0]  ;;  %v973_v16 = vld [vmem:[#allocation2 + $0x114] sm:$0xf]  ;;  %v493_v18 = vunpack.c.l.b16 %v474_v12 }
  0x3e   : > { %455 = vmatpush.bf16.msra.mxu2 %v808_v45  ;;  %v881_v17 = vld [vmem:[#allocation2 + $0x118] sm:$0xf0]  ;;  %v880_v19 = vor.u32 %v974_v15, %v879_v14  ;;  %v871_v21 = vld [vmem:[#allocation2 + $0x100] sm:$0xf]  ;;  %v972_v22 = vld [vmem:[#allocation2 + $0x104] sm:$0xf0] }
  0x3f   : > { %577 = vmatpush.bf16.msrb.mxu0 %v928_v38  ;;  %468 = vmatpush.bf16.msra.mxu3 %v812_v46  ;;  %v884_v20 = vor.u32 %v973_v16, %v881_v17  ;;  %v971_v23 = vld [vmem:[#allocation2 + $0x104] sm:$0xf]  ;;  %v873_v24 = vld [vmem:[#allocation2 + $0x108] sm:$0xf0]  ;;  %v494_v25 = vpack.c.b16 %v252_v36, %v493_v18  ;;  %v872_v26 = vor.u32 %v972_v22, %v871_v21  ;;  %v605_v37 = vld [vmem:[%s1394_s2] sm:$0x3] }
  0x40   : > { %590 = vmatpush.bf16.msrb.mxu1 %v932_v39  ;;  %350 = vmatmul.bf16.vlgmr.msra.gmra.mxu0 %v260_v56  ;;  %v876_v27 = vor.u32 %v971_v23, %v873_v24  ;;  %s202_s20 = sand.u32 1, %s1175_s13   ;;  %v607_v39 = vperm.slane %v605_v37, 0  ;;  %s936_s25 = sshll.u32 %s629_s21, 2  ;;  %v608_v42 = vperm.slane %v605_v37, 1 }
  0x41   : > { %363 = vmatmul.bf16.vlgmr.msra.gmra.mxu1 %v260_v56  ;;  %456 = vmatmul.bf16.vlgmr.msra.gmra.mxu2 %v214_v29  ;;  %v495_v28 = vrot.slane %v494_v25, 1  ;;  %s737_s24 = sshll.u32 %s202_s20, 3  ;;  %s631_s15 = scalar_lea.hbm %s1395_s3, %s936_s25 }
  0x42   : > { %469 = vmatmul.bf16.vlgmr.msra.gmra.mxu3 %v214_v29  ;;  %s204_s16 = scalar_lea.vmem [#allocation5], %s737_s24  ;;  %s635_s4 = sshll.u32 %s631_s15, 4  ;;  %s636_s4 = int_to_ptr.hbm [resolvable:$true] %s635_s4 }
  0x43   : > { %578 = vmatpush.bf16.msrb.mxu0 %v920_v49  ;;  %s633_s30 = sshll.u32 %s204_s16, 4  ;;  %s618_s5 = scalar_lea.sflag [#allocation4], %s202_s20  ;;  %s634_s30 = int_to_ptr.vmem [resolvable:$true] %s633_s30 }
  0x44   : > { %591 = vmatpush.bf16.msrb.mxu1 %v924_v50  ;;  %s1115_s6 = sshra.s32 %s636_s4, 4  ;;  %s1121_s11 = scalar_lea.hbm %s1395_s3, 32  ;;  %s1116_s6 = int_to_ptr.hbm [resolvable:$true] %s1115_s6 }
  0x45   : > { %s1117_s7 = scalar_lea.hbm %s1116_s6, 8  ;;  %p1122_p7 = scmp.lt.s32.totalorder %s1116_s6, %s1395_s3 }
  0x46   : > { %p1118_p4 = scmp.ne.s32.totalorder %s1116_s6, %s1117_s7  ;;  %p1123_p9 = scmp.lt.s32.totalorder %s1121_s11, %s1117_s7 }
  0x47   : > { %579 = vmatpush.bf16.msrb.mxu0 %v912_v57 }
  0x48   : > { %592 = vmatpush.bf16.msrb.mxu1 %v916_v58  ;;  %p1119_p5 = pnand %p1118_p4, %p1276_p3  ;;  %p1124_p10 = por %p1123_p9, %p1122_p7 }
  0x4a   : > { %p1120_p6 = pneg %p1119_p5 }
  0x4b   : > { %580 = vmatpush.bf16.msrb.mxu0 %v904_v63 }
  0x4c   : > { %593 = vmatpush.bf16.msrb.mxu1 %v908_v0  ;;  %p1125_p11 = pnand %p1124_p10, %p1120_p6 }
  0x4f   : > { %581 = vmatpush.bf16.msrb.mxu0 %v896_v5 }
  0x50   : > { %594 = vmatpush.bf16.msrb.mxu1 %v900_v6 }
  0x53   : > { %582 = vmatpush.bf16.msrb.mxu0 %v888_v11 }
  0x54   : > { %595 = vmatpush.bf16.msrb.mxu1 %v892_v13 }
  0x57   : > { %583 = vmatpush.bf16.msrb.mxu0 %v880_v19 }
  0x58   : > { %596 = vmatpush.bf16.msrb.mxu1 %v884_v20 }
  0x5b   : > { %584 = vmatpush.bf16.msrb.mxu0 %v872_v26 }
  0x5c   : > { %597 = vmatpush.bf16.msrb.mxu1 %v876_v27 }
  0x5e   : > { %585 = vmatmul.bf16.vlgmr.msrb.gmra.mxu0 %v495_v28 }
  0x5f   : > { %598 = vmatmul.bf16.vlgmr.msrb.gmra.mxu1 %v495_v28 }
  0xbd   : > { %v351_v29 = vpop.f32.mrf.mxu0 }
  0xbe   : > { %v364_v31 = vpop.f32.mrf.mxu1 }
  0xc4   : > { %v457_v32 = vpop.f32.mrf.mxu2 }
  0xc5   : > { %v353_v33 = vpop.f32.mrf.mxu0  ;;  %v470_v34 = vpop.f32.mrf.mxu3  ;;  %v458_v38 = vadd.f32 %v457_v32, %v351_v29 }
  0xc6   : > { %v366_v35 = vpop.f32.mrf.mxu1  ;;  %v471_v40 = vadd.f32 %v470_v34, %v364_v31 }
  0xcc   : > { %v459_v30 = vpop.f32.mrf.mxu2 }
  0xcd   : > { %v472_v36 = vpop.f32.mrf.mxu3 }
  0xdb   : > { %v586_v41 = vpop.f32.mrf.mxu0 }
  0xdc   : > { %v603_v43 = vadd.f32 %v586_v41, %v458_v38  ;;  %v599_v44 = vpop.f32.mrf.mxu1 }
  0xdd   : > { %v604_v45 = vadd.f32 %v599_v44, %v471_v40 }
  0xde   : > { %v611_v46 = vadd.f32 %v607_v39, %v603_v43 }
  0xdf   : > { %v612_v47 = vadd.f32 %v608_v42, %v604_v45 }
  0xe0   : > { %v613_v48 = vmax.f32 %v611_v46, 0.0 }
  0xe1   : > { %v614_v49 = vmax.f32 %v612_v47, 0.0 }
  0xe3   : > { %v615_v50 = vpack.c.bf16 %v614_v49, %v613_v48  ;;  %v588_v51 = vpop.f32.mrf.mxu0 }
  0xe4   : > { %v601_v52 = vpop.f32.mrf.mxu1 }
  0xe5   : > { %616 = vst [vmem:[%s204_s16] sm:$0xff] %v615_v50 }
  0xe6   : > { %1128 = shalt.err (!%p1125_p11)
}
  0xe7   : > { %991 = dma.vmem_to_hbm [thread:$0]  (%p1276_p3), %s634_s30, 128, %s636_s4, %s618_s5  }
  0xe8 PF: > { %p1003_p12 = scmp.ge.s32.totalorder %s1199_s19, 2  ;;  %s647_s20 = sand.u32 1, %s1171_s12  }
  0xe9   : > { %s648_s25 = scalar_lea.sflag [#allocation4], %s647_s20 }
  0xea   : > { %p998_p13 = pnand %p1003_p12, %p1285_p8 }
  0xec   : > { %p999_p0 = pneg %p998_p13 }
  0xee   : > { %1166 = dma.done.wait (%p999_p0), %s648_s25, 128  }
  0xef   : > { %1168 = vsyncadd (%p999_p0), %s648_s25, 4294967168  ;;  %s17_s19 = sadd.s32 1, %s1199_s19   ;;  %s1400_s12 = smov %s1175_s13 }
  0xf0   : > { %p14_p1 = scmp.ge.s32.totalorder %s17_s19, 6   ;;  %s1401_s13 = smov %s1179_s14 }
  0xf1   : > { %s1402_s14 = smov %s1306_s8  ;;  %s1403_s15 = smov %s1191_s17 }
  0xf2   : > { %s1404_s16 = smov %s1195_s18  ;;  %s1405_s17 = smov %s1408_s22 }
  0xf3   : > { %s1406_s18 = smov %s1412_s23  ;;  %16 = sbr.rel (!%p14_p1) target bundleno = 6 (0x6), region = 74 }
  0xf8   :  { %654 = vsyncpa [#allocation3], 1 }
  0xf9   :  { %656 = vsyncpa [#allocation3 + $0x1], 1 }
  0xfa   :  { %657 = vsyncpa [#allocation4], 1 }
  0xfb   :  { %659 = vsyncpa [#allocation4 + $0x1], 1 }

</bundles_post_ra>
